<compile_context>
chip_gen: v7x
topology: tpu7x:2x2x1
jax: 0.10.0
libtpu: 0.0.40
codegen_flags: <defaults>
</compile_context>

<pallas_src>
import numpy as np
import jax
import jax.numpy as jnp
from jax import lax
from jax.experimental import pallas as pl
from jax.experimental.pallas import tpu as pltpu

N_BINS = 15


def _round_up(x, m):
    return ((x + m - 1) // m) * m


def _make_ece_kernel(n_classes, n_bins):
    def kernel(sm_ref, lab_ref, out_ref, acc_ref):
        j = pl.program_id(1)

        @pl.when(j == 0)
        def _init():
            acc_ref[...] = jnp.zeros_like(acc_ref)
            out_ref[...] = jnp.zeros_like(out_ref)   # cheap insurance

        sm = sm_ref[...].astype(jnp.float32)          # (T, C)
        labels = lab_ref[...]                          # (T, 1) int32
        t = sm.shape[0]

        # confidences, predictions = torch.max(softmaxes, 1)
        conf = jnp.max(sm, axis=1, keepdims=True)      # (T, 1)
        col = lax.broadcasted_iota(jnp.int32, (t, n_classes), 1)
        pred = jnp.min(jnp.where(sm == conf, col, n_classes),
                       axis=1, keepdims=True)          # first-occurrence argmax
        correct = (pred == labels).astype(jnp.float32)  # (T, 1)

        # direct bin index: conf in (b/n_bins, (b+1)/n_bins] <=> b = ceil(conf*n_bins)-1
        bin_id = jnp.ceil(conf * float(n_bins)).astype(jnp.int32) - 1
        bin_id = jnp.clip(bin_id, 0, n_bins - 1)       # (T, 1)
        valid = conf > 0.0                              # padded zero rows drop out
        bcol = lax.broadcasted_iota(jnp.int32, (t, n_bins), 1)
        in_f = jnp.where(jnp.logical_and(bcol == bin_id, valid),
                         jnp.float32(1.0), jnp.float32(0.0))   # (T, n_bins)

        # Fold the row axis onto 8 sublanes (layout-free reshape) and reduce
        # the leading tile axis with plain VPU adds (no XLU cross-lane reduce).
        def fold(x):
            return jnp.sum(x.reshape(t // 8, 8, n_bins), axis=0)  # (8, n_bins)

        acc_ref[0] += fold(in_f)               # bin counts
        acc_ref[1] += fold(in_f * conf)        # bin confidence sums
        acc_ref[2] += fold(in_f * correct)     # bin accuracy sums

        @pl.when(j == pl.num_programs(1) - 1)
        def _finalize():
            out_ref[...] = acc_ref[...].reshape(out_ref.shape)

    return kernel


def ece_loss(softmaxes, labels, n_bins=N_BINS, tile_rows=1024, num_partials=2):
    """Pallas TPU implementation of ECELoss.forward. Returns shape (1,) f32."""
    softmaxes = jnp.asarray(softmaxes)
    if not jnp.issubdtype(softmaxes.dtype, jnp.floating):
        softmaxes = softmaxes.astype(jnp.float32)
    labels = jnp.asarray(labels, jnp.int32)
    n, c = softmaxes.shape
    itemsize = jnp.dtype(softmaxes.dtype).itemsize

    # --- tile sizing (generation-safe) ------------------------------------
    # Keep one softmax block <= ~8 MiB so double-buffering stays well under
    # v7x's 64 MiB VMEM; v5e/v6e (128 MiB) are covered a fortiori.
    max_rows_by_vmem = max(8, ((8 << 20) // max(1, c * itemsize)) // 8 * 8)
    per_part = _round_up(-(-n // num_partials), 8)
    tile_rows_eff = _round_up(max(8, min(tile_rows, per_part, max_rows_by_vmem)), 8)
    rows_per_part = _round_up(per_part, tile_rows_eff)
    steps = rows_per_part // tile_rows_eff
    n_padded = rows_per_part * num_partials

    pad = n_padded - n
    if pad:
        # zero softmax rows -> conf == 0 -> excluded from every bin
        softmaxes = jnp.pad(softmaxes, ((0, pad), (0, 0)))
        labels = jnp.pad(labels, ((0, pad),), constant_values=-1)
    labels2d = labels.reshape(n_padded, 1)

    # Explicit VMEM budget: 2 inputs x 2 buffers x block bytes + slack
    # (v5e default scoped limit is only 16 MiB).
    block_bytes = tile_rows_eff * c * itemsize + tile_rows_eff * 4
    vmem_limit_bytes = int(min(max(32 << 20, 4 * block_bytes + (4 << 20)), 56 << 20))

    kernel = _make_ece_kernel(n_classes=c, n_bins=n_bins)

    partials = pl.pallas_call(
        kernel,
        out_shape=jax.ShapeDtypeStruct((num_partials, 3, 8, n_bins), jnp.float32),
        grid_spec=pltpu.PrefetchScalarGridSpec(
            num_scalar_prefetch=0,
            grid=(num_partials, steps),
            in_specs=[
                pl.BlockSpec((tile_rows_eff, c), lambda p, j: (p * steps + j, 0)),
                pl.BlockSpec((tile_rows_eff, 1), lambda p, j: (p * steps + j, 0)),
            ],
            out_specs=pl.BlockSpec((1, 3, 8, n_bins), lambda p, j: (p, 0, 0, 0)),
            scratch_shapes=[pltpu.VMEM((3, 8, n_bins), jnp.float32)],
        ),
        compiler_params=pltpu.CompilerParams(
            dimension_semantics=("parallel", "arbitrary"),
            vmem_limit_bytes=vmem_limit_bytes),
    )(softmaxes, labels2d)

    # Tiny XLA epilogue: combine per-core / per-sublane partials (3*15 scalars).
    sums = jnp.sum(partials, axis=(0, 2))      # (3, n_bins)
    cnt, csum, asum = sums[0], sums[1], sums[2]
    denom = jnp.maximum(cnt, 1.0)
    prop = cnt / jnp.float32(n)                # proportion over the TRUE n
    gap = jnp.where(cnt > 0.0, jnp.abs(csum / denom - asum / denom) * prop, 0.0)
    return jnp.sum(gap).reshape(1)


def _ece_reference(softmaxes, labels, n_bins=N_BINS):
    """NumPy port of the PyTorch reference (for verification only)."""
    sm = np.asarray(softmaxes, np.float32)
    lab = np.asarray(labels)
    conf = sm.max(1)
    pred = sm.argmax(1)
    acc = (pred == lab).astype(np.float32)
    bounds = np.linspace(0.0, 1.0, n_bins + 1)
    ece = 0.0
    for lo, hi in zip(bounds[:-1], bounds[1:]):
        in_bin = (conf > lo) & (conf <= hi)
        prop = in_bin.mean()
        if prop > 0:
            ece += abs(conf[in_bin].mean() - acc[in_bin].mean()) * prop
    return np.array([ece], np.float32)


if __name__ == "__main__":
    key = jax.random.PRNGKey(0)
    k1, k2 = jax.random.split(key)

    N, C = 128, 10
    logits = jax.random.normal(k1, (N, C), dtype=jnp.float32)
    softmaxes = jax.nn.softmax(logits, axis=-1)
    labels = jax.random.randint(k2, (N,), 0, C, dtype=jnp.int32)

    out = jax.block_until_ready(ece_loss(softmaxes, labels))

    ref = _ece_reference(np.asarray(softmaxes), np.asarray(labels))
    np.testing.assert_allclose(np.asarray(out), ref, rtol=1e-4, atol=1e-5)

    print("KERNEL_OK")
</pallas_src>

<mosaic_0001>
module attributes {stable_mosaic.version = 11 : i64} {
  func.func @kernel(%arg0: i32, %arg1: i32, %arg2: memref<64x10xf32, #tpu.memory_space<vmem>>, %arg3: memref<64x1xi32, #tpu.memory_space<vmem>>, %arg4: memref<1x3x8x15xf32, #tpu.memory_space<vmem>>, %arg5: memref<3x8x15xf32, #tpu.memory_space<vmem>>) attributes {dimension_semantics = [#tpu.dimension_semantics<parallel>, #tpu.dimension_semantics<arbitrary>], iteration_bounds = array<i64: 2, 1>, scalar_prefetch = 0 : i64, scratch_operands = 1 : i64, tpu.core_type = #tpu.core_type<tc>, window_params = [{transform_indices = @transform_0, window_bounds = array<i64: 64, 10>}, {transform_indices = @transform_1, window_bounds = array<i64: 64, 1>}, {transform_indices = @transform_2, window_bounds = array<i64: 1, 3, 8, 15>}]} {
    %c0_i32 = arith.constant 0 : i32
    %0 = arith.cmpi eq, %arg1, %c0_i32 : i32
    %1 = arith.extui %0 : i1 to i32
    %c0_i32_0 = arith.constant 0 : i32
    %2 = arith.cmpi ne, %1, %c0_i32_0 : i32
    scf.if %2 {
      %cst_31 = arith.constant 0.000000e+00 : f32
      %68 = vector.broadcast %cst_31 : f32 to vector<3x8x15xf32>
      %c0_32 = arith.constant 0 : index
      %c0_33 = arith.constant 0 : index
      %c0_34 = arith.constant 0 : index
      %69 = vector.load %arg5[%c0_32, %c0_33, %c0_34] : memref<3x8x15xf32, #tpu.memory_space<vmem>>, vector<3x8x15xf32>
      tpu.vector_store %arg5[%c0_32, %c0_33, %c0_34], %68 {strides = array<i32>} : memref<3x8x15xf32, #tpu.memory_space<vmem>>, vector<3x8x15xf32>,
      %cst_35 = arith.constant 0.000000e+00 : f32
      %70 = vector.broadcast %cst_35 : f32 to vector<1x3x8x15xf32>
      %c0_36 = arith.constant 0 : index
      %c0_37 = arith.constant 0 : index
      %c0_38 = arith.constant 0 : index
      %c0_39 = arith.constant 0 : index
      %71 = vector.load %arg4[%c0_36, %c0_37, %c0_38, %c0_39] : memref<1x3x8x15xf32, #tpu.memory_space<vmem>>, vector<1x3x8x15xf32>
      tpu.vector_store %arg4[%c0_36, %c0_37, %c0_38, %c0_39], %70 {strides = array<i32>} : memref<1x3x8x15xf32, #tpu.memory_space<vmem>>, vector<1x3x8x15xf32>,
    } else {
    }
    %c0 = arith.constant 0 : index
    %c0_1 = arith.constant 0 : index
    %3 = vector.load %arg2[%c0, %c0_1] : memref<64x10xf32, #tpu.memory_space<vmem>>, vector<64x10xf32>
    %c0_2 = arith.constant 0 : index
    %c0_3 = arith.constant 0 : index
    %4 = vector.load %arg3[%c0_2, %c0_3] : memref<64x1xi32, #tpu.memory_space<vmem>>, vector<64x1xi32>
    %cst = arith.constant dense<0xFF800000> : vector<64xf32>
    %5 = vector.multi_reduction <maximumf>, %3, %cst [1] : vector<64x10xf32> to vector<64xf32>
    %6 = vector.shape_cast %5 : vector<64xf32> to vector<64x1xf32>
    %7 = tpu.iota {dimensions = array<i32: 1>} : vector<64x10xi32>
    %8 = vector.broadcast %6 : vector<64x1xf32> to vector<64x10xf32>
    %9 = arith.cmpf oeq, %3, %8 : vector<64x10xf32>
    %c10_i32 = arith.constant 10 : i32
    %10 = vector.broadcast %c10_i32 : i32 to vector<64x10xi32>
    %11 = arith.select %9, %7, %10 : vector<64x10xi1>, vector<64x10xi32>
    %cst_4 = arith.constant dense<2147483647> : vector<64xi32>
    %12 = vector.multi_reduction <minsi>, %11, %cst_4 [1] : vector<64x10xi32> to vector<64xi32>
    %13 = vector.shape_cast %12 : vector<64xi32> to vector<64x1xi32>
    %14 = arith.cmpi eq, %13, %4 : vector<64x1xi32>
    %15 = arith.extui %14 : vector<64x1xi1> to vector<64x1xi32>
    %16 = arith.sitofp %15 : vector<64x1xi32> to vector<64x1xf32>
    %cst_5 = arith.constant 1.500000e+01 : f32
    %17 = vector.broadcast %cst_5 : f32 to vector<64x1xf32>
    %18 = arith.mulf %6, %17 : vector<64x1xf32>
    %19 = math.ceil %18 : vector<64x1xf32>
    %20 = arith.fptosi %19 : vector<64x1xf32> to vector<64x1xi32>
    %c1_i32 = arith.constant 1 : i32
    %21 = vector.broadcast %c1_i32 : i32 to vector<64x1xi32>
    %22 = arith.subi %20, %21 : vector<64x1xi32>
    %c0_i32_6 = arith.constant 0 : i32
    %c14_i32 = arith.constant 14 : i32
    %23 = vector.broadcast %c0_i32_6 : i32 to vector<64x1xi32>
    %24 = arith.maxsi %23, %22 : vector<64x1xi32>
    %25 = vector.broadcast %c14_i32 : i32 to vector<64x1xi32>
    %26 = arith.minsi %25, %24 : vector<64x1xi32>
    %cst_7 = arith.constant 0.000000e+00 : f32
    %27 = vector.broadcast %cst_7 : f32 to vector<64x1xf32>
    %28 = arith.cmpf ogt, %6, %27 : vector<64x1xf32>
    %29 = tpu.iota {dimensions = array<i32: 1>} : vector<64x15xi32>
    %30 = vector.broadcast %26 : vector<64x1xi32> to vector<64x15xi32>
    %31 = arith.cmpi eq, %29, %30 : vector<64x15xi32>
    %32 = vector.broadcast %28 : vector<64x1xi1> to vector<64x15xi1>
    %33 = arith.andi %31, %32 : vector<64x15xi1>
    %cst_8 = arith.constant 1.000000e+00 : f32
    %cst_9 = arith.constant 0.000000e+00 : f32
    %34 = vector.broadcast %cst_8 : f32 to vector<64x15xf32>
    %35 = vector.broadcast %cst_9 : f32 to vector<64x15xf32>
    %36 = arith.select %33, %34, %35 : vector<64x15xi1>, vector<64x15xf32>
    %c0_10 = arith.constant 0 : index
    %c0_11 = arith.constant 0 : index
    %c0_12 = arith.constant 0 : index
    %37 = vector.load %arg5[%c0_10, %c0_11, %c0_12] : memref<3x8x15xf32, #tpu.memory_space<vmem>>, vector<1x8x15xf32>
    %38 = vector.shape_cast %37 : vector<1x8x15xf32> to vector<8x15xf32>
    %39 = vector.shape_cast %36 : vector<64x15xf32> to vector<8x8x15xf32>
    %cst_13 = arith.constant dense<0.000000e+00> : vector<8x15xf32>
    %40 = vector.multi_reduction <add>, %39, %cst_13 [0] : vector<8x8x15xf32> to vector<8x15xf32>
    %41 = arith.addf %38, %40 : vector<8x15xf32>
    %c0_14 = arith.constant 0 : index
    %c0_15 = arith.constant 0 : index
    %c0_16 = arith.constant 0 : index
    %42 = vector.load %arg5[%c0_14, %c0_15, %c0_16] : memref<3x8x15xf32, #tpu.memory_space<vmem>>, vector<1x8x15xf32>
    %43 = vector.shape_cast %42 : vector<1x8x15xf32> to vector<8x15xf32>
    %44 = vector.shape_cast %41 : vector<8x15xf32> to vector<1x8x15xf32>
    tpu.vector_store %arg5[%c0_14, %c0_15, %c0_16], %44 {strides = array<i32>} : memref<3x8x15xf32, #tpu.memory_space<vmem>>, vector<1x8x15xf32>,
    %c1 = arith.constant 1 : index
    %c0_17 = arith.constant 0 : index
    %c0_18 = arith.constant 0 : index
    %45 = vector.load %arg5[%c1, %c0_17, %c0_18] : memref<3x8x15xf32, #tpu.memory_space<vmem>>, vector<1x8x15xf32>
    %46 = vector.shape_cast %45 : vector<1x8x15xf32> to vector<8x15xf32>
    %47 = vector.broadcast %6 : vector<64x1xf32> to vector<64x15xf32>
    %48 = arith.mulf %36, %47 : vector<64x15xf32>
    %49 = vector.shape_cast %48 : vector<64x15xf32> to vector<8x8x15xf32>
    %cst_19 = arith.constant dense<0.000000e+00> : vector<8x15xf32>
    %50 = vector.multi_reduction <add>, %49, %cst_19 [0] : vector<8x8x15xf32> to vector<8x15xf32>
    %51 = arith.addf %46, %50 : vector<8x15xf32>
    %c1_20 = arith.constant 1 : index
    %c0_21 = arith.constant 0 : index
    %c0_22 = arith.constant 0 : index
    %52 = vector.load %arg5[%c1_20, %c0_21, %c0_22] : memref<3x8x15xf32, #tpu.memory_space<vmem>>, vector<1x8x15xf32>
    %53 = vector.shape_cast %52 : vector<1x8x15xf32> to vector<8x15xf32>
    %54 = vector.shape_cast %51 : vector<8x15xf32> to vector<1x8x15xf32>
    tpu.vector_store %arg5[%c1_20, %c0_21, %c0_22], %54 {strides = array<i32>} : memref<3x8x15xf32, #tpu.memory_space<vmem>>, vector<1x8x15xf32>,
    %c2 = arith.constant 2 : index
    %c0_23 = arith.constant 0 : index
    %c0_24 = arith.constant 0 : index
    %55 = vector.load %arg5[%c2, %c0_23, %c0_24] : memref<3x8x15xf32, #tpu.memory_space<vmem>>, vector<1x8x15xf32>
    %56 = vector.shape_cast %55 : vector<1x8x15xf32> to vector<8x15xf32>
    %57 = vector.broadcast %16 : vector<64x1xf32> to vector<64x15xf32>
    %58 = arith.mulf %36, %57 : vector<64x15xf32>
    %59 = vector.shape_cast %58 : vector<64x15xf32> to vector<8x8x15xf32>
    %cst_25 = arith.constant dense<0.000000e+00> : vector<8x15xf32>
    %60 = vector.multi_reduction <add>, %59, %cst_25 [0] : vector<8x8x15xf32> to vector<8x15xf32>
    %61 = arith.addf %56, %60 : vector<8x15xf32>
    %c2_26 = arith.constant 2 : index
    %c0_27 = arith.constant 0 : index
    %c0_28 = arith.constant 0 : index
    %62 = vector.load %arg5[%c2_26, %c0_27, %c0_28] : memref<3x8x15xf32, #tpu.memory_space<vmem>>, vector<1x8x15xf32>
    %63 = vector.shape_cast %62 : vector<1x8x15xf32> to vector<8x15xf32>
    %64 = vector.shape_cast %61 : vector<8x15xf32> to vector<1x8x15xf32>
    tpu.vector_store %arg5[%c2_26, %c0_27, %c0_28], %64 {strides = array<i32>} : memref<3x8x15xf32, #tpu.memory_space<vmem>>, vector<1x8x15xf32>,
    %c0_i32_29 = arith.constant 0 : i32
    %65 = arith.cmpi eq, %arg1, %c0_i32_29 : i32
    %66 = arith.extui %65 : i1 to i32
    %c0_i32_30 = arith.constant 0 : i32
    %67 = arith.cmpi ne, %66, %c0_i32_30 : i32
    scf.if %67 {
      %c0_31 = arith.constant 0 : index
      %c0_32 = arith.constant 0 : index
      %c0_33 = arith.constant 0 : index
      %68 = vector.load %arg5[%c0_31, %c0_32, %c0_33] : memref<3x8x15xf32, #tpu.memory_space<vmem>>, vector<3x8x15xf32>
      %69 = vector.shape_cast %68 : vector<3x8x15xf32> to vector<1x3x8x15xf32>
      %c0_34 = arith.constant 0 : index
      %c0_35 = arith.constant 0 : index
      %c0_36 = arith.constant 0 : index
      %c0_37 = arith.constant 0 : index
      %70 = vector.load %arg4[%c0_34, %c0_35, %c0_36, %c0_37] : memref<1x3x8x15xf32, #tpu.memory_space<vmem>>, vector<1x3x8x15xf32>
      tpu.vector_store %arg4[%c0_34, %c0_35, %c0_36, %c0_37], %69 {strides = array<i32>} : memref<1x3x8x15xf32, #tpu.memory_space<vmem>>, vector<1x3x8x15xf32>,
    } else {
    }
    return
  }
  func.func @transform_0(%arg0: i32, %arg1: i32) -> (i32, i32) {
    %c1_i32 = arith.constant 1 : i32
    %0 = arith.muli %arg0, %c1_i32 : i32
    %1 = arith.addi %0, %arg1 : i32
    %c0_i32 = arith.constant 0 : i32
    %c0_i32_0 = arith.constant 0 : i32
    return %1, %c0_i32 : i32, i32
  }
  func.func @transform_1(%arg0: i32, %arg1: i32) -> (i32, i32) {
    %c1_i32 = arith.constant 1 : i32
    %0 = arith.muli %arg0, %c1_i32 : i32
    %1 = arith.addi %0, %arg1 : i32
    %c0_i32 = arith.constant 0 : i32
    %c0_i32_0 = arith.constant 0 : i32
    return %1, %c0_i32 : i32, i32
  }
  func.func @transform_2(%arg0: i32, %arg1: i32) -> (i32, i32, i32, i32) {
    %c0_i32 = arith.constant 0 : i32
    %c0_i32_0 = arith.constant 0 : i32
    %c0_i32_1 = arith.constant 0 : i32
    %c0_i32_2 = arith.constant 0 : i32
    return %arg0, %c0_i32, %c0_i32_0, %c0_i32_1 : i32, i32, i32, i32
  }
}

</mosaic_0001>

<bundles_post_ra>
// kernel: tpu_custom_call.1
= control target key start
LH: loop header
LB: loop body
LE: loop exit
PB: predicated region body
PF: predicated region fallthrough
CT: control target
= control target key end

     0   :  { %7 = vsyncpa [#allocation4], 0  ;;  %s1378_s0 = inlined_call_operand.vmem [shape: f32[128,10], index: 0, kind: input, shape index: {}]   ;;  %s1379_s1 = inlined_call_operand.vmem [shape: s32[128,1], index: 1, kind: input, shape index: {}]   ;;  %s1380_s2 = inlined_call_operand.hbm [shape: f32[2,3,8,15], index: 2, kind: output, shape index: {}]  }
   0x1   :  { %9 = vsyncpa [#allocation4 + $0x1], 0  ;;  %s948_s9 = smov 0   ;;  %s950_s10 = smov 0  }
   0x2   :  { %s952_s11 = smov 0   ;;  %s954_s12 = smov 0  }
   0x3   :  { %s956_s13 = smov 0   ;;  %s958_s14 = smov 0  }
   0x4 LB: > { %s736_s15 = sadd.s32 4294967295, %s926_s14   ;;  %s737_s16 = sadd.s32 4294967294, %s926_s14   ;;  %s926_s14 = sphi %s958_s14, %s15_s14   ;;  %s922_s13 = sphi %s956_s13, %s1387_s13   ;;  %s918_s12 = sphi %s954_s12, %s1386_s12   ;;  %s914_s11 = sphi %s952_s11, %s1385_s11   ;;  %s910_s10 = sphi %s950_s10, %s1384_s10   ;;  %s906_s9 = sphi %s948_s9, %s1383_s9  }
   0x5   : > { %s27_s17 = sadd.s32 1, %s922_s13  ;;  %s90_s18 = sadd.s32 1, %s914_s11 }
   0x6   : > { %p29_p0 = scmp.ge.s32.totalorder %s27_s17, 2  ;;  %p100_p1 = scmp.ne.s32.totalorder %s914_s11, %s910_s10 }
   0x7   : > { %p101_p2 = scmp.eq.s32.totalorder %s736_s15, 1  ;;  %p106_p3 = scmp.ne.s32.totalorder %s910_s10, %s906_s9 }
   0x8   : > { %s1389_s17 = smov (%p29_p0, %s27_s17), 0  ;;  %p107_p5 = scmp.eq.s32.totalorder %s737_s16, 1 }
   0x9   : > { %p988_p4 = por %p101_p2, %p100_p1  ;;  %s87_s20 = ssub.s32 %s922_s13, %s1389_s17 }
   0xa   : > { %p740_p6 = scmp.ge.s32.totalorder %s926_s14, 1  ;;  %p88_p7 = scmp.eq.s32.totalorder %s87_s20, 0 }
   0xb   : > { %p995_p8 = por %p107_p5, %p106_p3  ;;  %p147_p9 = scmp.lt.s32.totalorder %s926_s14, 3 }
   0xc   : > { %s1001_s22 = scalar_select %p88_p7, %s914_s11, %s90_s18  }
   0xd   : > { %p148_p10 = pnand %p740_p6, %p147_p9 }
   0xe   : > { %s741_s23 = sshll.u32 (!%p148_p10), %s918_s12, 3  ;;  %vm219_vm0 = vcmask (!%p148_p10), 80896   ;;  %vm196_vm1 = vcmask (!%p148_p10), 121856   ;;  %v928_v16 = vmov (!%p148_p10), 0.0   ;;  %s173_s28 = sand.u32 (!%p148_p10), 1, %s910_s10   ;;  %v244_v17 = vlaneseq (!%p148_p10) }
   0xf   : > { %151 = sbr.rel (%p148_p10) target bundleno = 650 (0x28a), region = 28  ;;  %p178_p11 = scmp.lt.s32.totalorder (!%p148_p10), %s741_s23, 15  ;;  %197 = vst.msk [vmem:[#allocation2] sm:$0xff] (!%p148_p10), %vm196_vm1, %v928_v16  ;;  %198 = vst.msk [vmem:[#allocation2 + $0x8] sm:$0xff] (!%p148_p10), %vm196_vm1, %v928_v16 }
  0x10   : > { %199 = vst.msk [vmem:[#allocation2 + $0x10] sm:$0xff] (!%p148_p10), %vm196_vm1, %v928_v16  ;;  %s764_s29 = smul.u32 (!%p148_p10), 24, %s173_s28  ;;  %v1055_v18 = vand.u32 (!%p148_p10), 127, %v244_v17  ;;  %s1332_s18 = scalar_lea.sflag (!%p148_p10), [#allocation4], %s173_s28 }
  0x11   : > { %s781_s6 = smul.u32 (!%p148_p10), 384, %s918_s12  ;;  %s930_s12 = smov (!%p148_p10), [#allocation3]  }
  0x12   : > { %s1044_s30 = scalar_lea.vmem (!%p148_p10), [#allocation3], %s764_s29 }
  0x13   : > { %200 = vst.msk [vmem:[%s1044_s30] sm:$0xff] (!%p148_p10), %vm196_vm1, %v928_v16  ;;  %201 = vst.msk [vmem:[%s1044_s30 + $0x8] sm:$0xff] (!%p148_p10), %vm196_vm1, %v928_v16  ;;  %s654_s7 = sshll.u32 (!%p148_p10), %s1044_s30, 4  ;;  %s1324_s16 = scalar_lea.hbm (!%p148_p10), %s1380_s2, %s781_s6  ;;  %s1326_s7 = int_to_ptr.vmem [resolvable:$true] %s654_s7 }
  0x14   : > { %202 = vst.msk [vmem:[%s1044_s30 + $0x10] sm:$0xff] (!%p148_p10), %vm196_vm1, %v928_v16  ;;  %s848_s20 = scalar_lea.vmem (!%p148_p10), %s1326_s7, 384 }
  0x15   : > { %p849_p12 = scmp.ne.s32.totalorder (!%p148_p10), %s1326_s7, %s848_s20 }
  0x16   : > { %s1391_s23 = smov (!%p178_p11, %s741_s23), 15 }
  0x17   : > { %s742_s24 = sshll.u32 %s1391_s23, 3  ;;  %p850_p13 = pnand %p849_p12, %p988_p4 }
  0x18   : > { %s181_s27 = scalar_lea.vmem %s1378_s0, %s742_s24  ;;  %s1281_s5 = scalar_lea.vmem %s1379_s1, %s742_s24 }
  0x19   : > { %v205_v0 = vld [vmem:[%s181_s27 + $0x10] sm:$0xff]  ;;  %v203_v1 = vld [vmem:[%s181_s27] sm:$0xff]  ;;  %v1012_v2 = vld [vmem:[%s181_s27 + $0x18] sm:$0xff]  ;;  %p851_p0 = pneg %p850_p13  ;;  %s852_s23 = sshll.u32 %s930_s12, 4  ;;  %s853_s23 = int_to_ptr.vmem [resolvable:$false] %s852_s23 }
  0x1a   : > { %v226_v3 = vsel %vm219_vm0, %v205_v0, -inf  ;;  %v220_v4 = vsel %vm219_vm0, %v203_v1, -inf  ;;  %v204_v5 = vld [vmem:[%s181_s27 + $0x8] sm:$0xff]  ;;  %v229_v6 = vsel %vm219_vm0, %v1012_v2, -inf  ;;  %v1021_v9 = vld [vmem:[%s181_s27 + $0x20] sm:$0xff]  ;;  %v1027_v12 = vld [vmem:[%s181_s27 + $0x38] sm:$0xff]  ;;  %p855_p1 = scmp.lt.s32.totalorder %s1326_s7, %s853_s23 }
  0x1b   : > { %227 = vmax.xlane.f32.xlu1 %v226_v3  ;;  %221 = vmax.xlane.f32.xlu0 %v220_v4  ;;  %v223_v7 = vsel %vm219_vm0, %v204_v5, -inf  ;;  %v1019_v8 = vld [vmem:[%s181_s27 + $0x28] sm:$0xff]  ;;  %v232_v11 = vsel %vm219_vm0, %v1021_v9, -inf  ;;  %v1029_v13 = vld [vmem:[%s181_s27 + $0x30] sm:$0xff]  ;;  %v241_v14 = vsel %vm219_vm0, %v1027_v12, -inf  ;;  %s854_s24 = scalar_lea.vmem %s853_s23, 768 }
  0x1c   : > { %v235_v10 = vsel %vm219_vm0, %v1019_v8, -inf  ;;  %v238_v15 = vsel %vm219_vm0, %v1029_v13, -inf  ;;  %p856_p2 = scmp.lt.s32.totalorder %s854_s24, %s848_s20 }
  0x1e   : > { %p857_p3 = por %p856_p2, %p855_p1 }
  0x1f   : > { %230 = vmax.xlane.f32.xlu1 %v229_v6  ;;  %224 = vmax.xlane.f32.xlu0 %v223_v7 }
  0x20   : > { %p858_p5 = pnand %p857_p3, %p851_p0 }
  0x23   : > { %236 = vmax.xlane.f32.xlu1 %v235_v10  ;;  %233 = vmax.xlane.f32.xlu0 %v232_v11 }
  0x27   : > { %242 = vmax.xlane.f32.xlu1 %v241_v14  ;;  %239 = vmax.xlane.f32.xlu0 %v238_v15 }
  0xa8   : > { %v1057_v19 = vpop.xlane.xlu1 %227  ;;  %v1059_v20 = vpop.xlane.xlu0 %221 }
  0xa9   : > { %vm246_vm2 = vcmp.eq.f32.partialorder %v203_v1, %v1059_v20  ;;  %vm248_vm3 = vcmp.eq.f32.partialorder %v205_v0, %v1057_v19  ;;  %v408_v22 = vmul.f32 15.0, %v1057_v19  ;;  %v406_v25 = vmul.f32 15.0, %v1059_v20 }
  0xaa   : > { %v254_v21 = vsel %vm246_vm2, %v1055_v18, 10  ;;  %v256_v24 = vsel %vm248_vm3, %v1055_v18, 10  ;;  %vm470_vm10 = vcmp.gt.f32.partialorder %v1059_v20, 0.0  ;;  %vm472_vm12 = vcmp.gt.f32.partialorder %v1057_v19, 0.0 }
  0xab   : > { %v1066_v23 = vsel %vm219_vm0, %v254_v21, 2147483647  ;;  %v1076_v29 = vsel %vm219_vm0, %v256_v24, 2147483647  ;;  %v416_v34 = vceil.f32 %v408_v22  ;;  %v414_v35 = vceil.f32 %v406_v25 }
  0xac   : > { %v1070_v26 = vpop.xlane.xlu1 %230  ;;  %v1072_v27 = vpop.xlane.xlu0 %224  ;;  %v264_v28 = vshra.s32 %v1066_v23, 16  ;;  %v294_v33 = vshra.s32 %v1076_v29, 16 }
  0xad   : > { %v409_v30 = vmul.f32 15.0, %v1070_v26  ;;  %v407_v31 = vmul.f32 15.0, %v1072_v27  ;;  %vm247_vm4 = vcmp.eq.f32.partialorder %v204_v5, %v1072_v27  ;;  %vm249_vm5 = vcmp.eq.f32.partialorder %v1012_v2, %v1070_v26 }
  0xae   : > { %v1080_v32 = vcvt.s32.f32 %v264_v28  ;;  %v1089_v38 = vcvt.s32.f32 %v294_v33  ;;  %v255_v39 = vsel %vm247_vm4, %v1055_v18, 10  ;;  %v257_v45 = vsel %vm249_vm5, %v1055_v18, 10 }
  0xaf   : > { %v417_v40 = vceil.f32 %v409_v30  ;;  %v415_v41 = vceil.f32 %v407_v31  ;;  %v1097_v44 = vsel %vm219_vm0, %v255_v39, 2147483647  ;;  %v769_v46 = vtrunc.f32 %v416_v34 }
  0xb0   : > { %v1084_v36 = vpop.xlane.xlu1 %236  ;;  %267 = vmin.xlane.f32.xlu0 %v1080_v32  ;;  %v1087_v37 = vpop.xlane.xlu0 %233  ;;  %v279_v47 = vshra.s32 %v1097_v44, 16  ;;  %v1102_v48 = vsel %vm219_vm0, %v257_v45, 2147483647  ;;  %v765_v49 = vtrunc.f32 %v414_v35  ;;  %vm471_vm13 = vcmp.gt.f32.partialorder %v1072_v27, 0.0 }
  0xb1   : > { %v411_v42 = vmul.f32 15.0, %v1084_v36  ;;  %v410_v43 = vmul.f32 15.0, %v1087_v37  ;;  %v309_v53 = vshra.s32 %v1102_v48, 16  ;;  %vm250_vm6 = vcmp.eq.f32.partialorder %v1021_v9, %v1087_v37 }
  0xb2   : > { %v1113_v55 = vcvt.s32.f32 %v279_v47  ;;  %v771_v56 = vtrunc.f32 %v417_v40  ;;  %v767_v57 = vtrunc.f32 %v415_v41  ;;  %v258_v61 = vsel %vm250_vm6, %v1055_v18, 10 }
  0xb3   : > { %v419_v50 = vceil.f32 %v411_v42  ;;  %v418_v58 = vceil.f32 %v410_v43  ;;  %v1117_v60 = vcvt.s32.f32 %v309_v53  ;;  %vm251_vm7 = vcmp.eq.f32.partialorder %v1019_v8, %v1084_v36 }
  0xb4   : > { %v1104_v51 = vpop.xlane.xlu1 %242  ;;  %297 = vmin.xlane.f32.xlu0 %v1089_v38  ;;  %v1107_v52 = vpop.xlane.xlu0 %239  ;;  %282 = vmin.xlane.f32.xlu1 %v1113_v55  ;;  %v770_v62 = vcvt.f32.s32 %v769_v46  ;;  %v766_v63 = vcvt.f32.s32 %v765_v49  ;;  %v1125_v1 = vsel %vm219_vm0, %v258_v61, 2147483647  ;;  %v259_v4 = vsel %vm251_vm7, %v1055_v18, 10 }
  0xb5   : > { %v413_v54 = vmul.f32 15.0, %v1104_v51  ;;  %v412_v59 = vmul.f32 15.0, %v1107_v52  ;;  %vm252_vm8 = vcmp.eq.f32.partialorder %v1029_v13, %v1107_v52  ;;  %v775_v0 = vtrunc.f32 %v419_v50 }
  0xb6   : > { %v324_v3 = vshra.s32 %v1125_v1, 16  ;;  %v260_v5 = vsel %vm252_vm8, %v1055_v18, 10  ;;  %v772_v6 = vcvt.f32.s32 %v771_v56  ;;  %v773_v7 = vtrunc.f32 %v418_v58 }
  0xb7   : > { %v421_v2 = vceil.f32 %v413_v54  ;;  %v420_v9 = vceil.f32 %v412_v59  ;;  %v1131_v8 = vsel %vm219_vm0, %v259_v4, 2147483647  ;;  %v768_v10 = vcvt.f32.s32 %v767_v57 }
  0xb8   : > { %312 = vmin.xlane.f32.xlu1 %v1117_v60  ;;  %v1134_v11 = vcvt.s32.f32 %v324_v3  ;;  %v339_v13 = vshra.s32 %v1131_v8, 16  ;;  %v1138_v14 = vsel %vm219_vm0, %v260_v5, 2147483647  ;;  %v755_v15 = vadd.s32 4294967295, %v770_v62 }
  0xb9   : > { %v354_v17 = vshra.s32 %v1138_v14, 16  ;;  %vm253_vm9 = vcmp.eq.f32.partialorder %v1027_v12, %v1104_v51  ;;  %v776_v21 = vcvt.f32.s32 %v775_v0  ;;  %v779_v22 = vtrunc.f32 %v421_v2 }
  0xba   : > { %327 = vmin.xlane.f32.xlu0 %v1134_v11  ;;  %v1144_v24 = vcvt.s32.f32 %v339_v13  ;;  %v261_v25 = vsel %vm253_vm9, %v1055_v18, 10  ;;  %v774_v28 = vcvt.f32.s32 %v773_v7  ;;  %v777_v30 = vtrunc.f32 %v420_v9 }
  0xbb   : > { %v1147_v31 = vcvt.s32.f32 %v354_v17  ;;  %v1150_v33 = vsel %vm219_vm0, %v261_v25, 2147483647  ;;  %v753_v34 = vadd.s32 4294967295, %v766_v63  ;;  %v756_v35 = vadd.s32 4294967295, %v772_v6 }
  0xbc   : > { %v754_v39 = vadd.s32 4294967295, %v768_v10  ;;  %342 = vmin.xlane.f32.xlu1 %v1144_v24  ;;  %v369_v12 = vshra.s32 %v1150_v33, 16  ;;  %vm442_vm11 = vcmp.gt.s32.totalorder %v755_v15, 0  ;;  %v780_v40 = vcvt.f32.s32 %v779_v22 }
  0xbd   : > { %v443_v42 = vsel %vm442_vm11, %v755_v15, 0  ;;  %v758_v43 = vadd.s32 4294967295, %v776_v21  ;;  %v757_v45 = vadd.s32 4294967295, %v774_v28  ;;  %v778_v46 = vcvt.f32.s32 %v777_v30 }
  0xbe   : > { %357 = vmin.xlane.f32.xlu0 %v1147_v31  ;;  %v1158_v41 = vcvt.s32.f32 %v369_v12  ;;  %vm458_vm14 = vcmp.lt.s32.totalorder %v443_v42, 14  ;;  %vm438_vm15 = vcmp.gt.s32.totalorder %v753_v34, 0  ;;  %vm440_vm0 = vcmp.gt.s32.totalorder %v754_v39, 0 }
  0xbf   : > { %v459_v47 = vsel %vm458_vm14, %v443_v42, 14  ;;  %vm444_vm2 = vcmp.gt.s32.totalorder %v756_v35, 0  ;;  %v439_v49 = vsel %vm438_vm15, %v753_v34, 0  ;;  %v441_v50 = vsel %vm440_vm0, %v754_v39, 0 }
  0xc0   : > { %372 = vmin.xlane.f32.xlu1 %v1158_v41  ;;  %vm480_vm3 = vcmp.eq.s32.totalorder %v1055_v18, %v459_v47  ;;  %v445_v53 = vsel %vm444_vm2, %v756_v35, 0  ;;  %v1162_v54 = vadd.s32 4294967295, %v780_v40  ;;  %vm454_vm5 = vcmp.lt.s32.totalorder %v439_v49, 14 }
  0xc1   : > { %vm504_vm4 = vmand %vm480_vm3, %vm472_vm12  ;;  %vm456_vm6 = vcmp.lt.s32.totalorder %v441_v50, 14  ;;  %vm460_vm7 = vcmp.lt.s32.totalorder %v445_v53, 14  ;;  %v455_v57 = vsel %vm454_vm5, %v439_v49, 14  ;;  %v759_v61 = vadd.s32 4294967295, %v778_v46 }
  0xc2   : > { %v1167_v56 = vsel %vm504_vm4, 1.0, %v928_v16  ;;  %v457_v58 = vsel %vm456_vm6, %v441_v50, 14  ;;  %v461_v59 = vsel %vm460_vm7, %v445_v53, 14  ;;  %vm478_vm8 = vcmp.eq.s32.totalorder %v1055_v18, %v455_v57 }
  0xc3   : > { %vm479_vm9 = vcmp.eq.s32.totalorder %v1055_v18, %v457_v58  ;;  %vm473_vm11 = vcmp.gt.f32.partialorder %v1070_v26, 0.0  ;;  %v541_v62 = vmul.f32 %v1167_v56, %v1057_v19  ;;  %vm502_vm12 = vmand %vm478_vm8, %vm470_vm10  ;;  %vm481_vm14 = vcmp.eq.s32.totalorder %v1055_v18, %v461_v59 }
  0xc4   : > { %vm446_vm15 = vcmp.gt.s32.totalorder %v757_v45, 0  ;;  %vm448_vm0 = vcmp.gt.s32.totalorder %v758_v43, 0  ;;  %v523_v63 = vsel %vm196_vm1, %v1167_v56, 0.0  ;;  %vm503_vm2 = vmand %vm479_vm9, %vm471_vm13  ;;  %v1182_v0 = vsel %vm502_vm12, 1.0, %v928_v16 }
  0xc5   : > { %v447_v2 = vsel %vm446_vm15, %v757_v45, 0  ;;  %v449_v3 = vsel %vm448_vm0, %v758_v43, 0  ;;  %v1185_v19 = vsel %vm503_vm2, 1.0, %v928_v16  ;;  %v520_v4 = vsel %vm196_vm1, %v1182_v0, 0.0  ;;  %vm505_vm10 = vmand %vm481_vm14, %vm473_vm11 }
  0xc6   : > { %v539_v5 = vmul.f32 %v1182_v0, %v1059_v20  ;;  %vm462_vm3 = vcmp.lt.s32.totalorder %v447_v2, 14  ;;  %v521_v6 = vsel %vm196_vm1, %v1185_v19, 0.0  ;;  %v540_v7 = vmul.f32 %v1185_v19, %v1072_v27 }
  0xc7   : > { %v1196_v9 = vsel %vm505_vm10, 1.0, %v928_v16  ;;  %v463_v10 = vsel %vm462_vm3, %v447_v2, 14  ;;  %v550_v13 = vsel %vm196_vm1, %v541_v62, 0.0  ;;  %v522_v15 = vadd.f32 %v521_v6, %v520_v4  ;;  %v518_v4 = vld [vmem:[#allocation2] sm:$0xff] }
  0xc8   : > { %v542_v17 = vmul.f32 %v1196_v9, %v1070_v26  ;;  %vm474_vm13 = vcmp.gt.f32.partialorder %v1087_v37, 0.0  ;;  %v547_v20 = vsel %vm196_vm1, %v539_v5, 0.0  ;;  %v548_v21 = vsel %vm196_vm1, %v540_v7, 0.0 }
  0xc9   : > { %vm482_vm4 = vcmp.eq.s32.totalorder %v1055_v18, %v463_v10  ;;  %vm464_vm5 = vcmp.lt.s32.totalorder %v449_v3, 14  ;;  %v549_v27 = vadd.f32 %v548_v21, %v547_v20  ;;  %v524_v22 = vadd.f32 %v523_v63, %v522_v15  ;;  %v538_v10 = vld [vmem:[#allocation2 + $0x8] sm:$0xff] }
  0xca   : > { %v525_v25 = vsel %vm196_vm1, %v1196_v9, 0.0  ;;  %vm506_vm6 = vmand %vm482_vm4, %vm474_vm13  ;;  %v465_v28 = vsel %vm464_vm5, %v449_v3, 14  ;;  %vm475_vm7 = vcmp.gt.f32.partialorder %v1084_v36, 0.0  ;;  %vm450_vm9 = vcmp.gt.s32.totalorder %v759_v61, 0 }
  0xcb   : > { %v1208_v30 = vsel %vm506_vm6, 1.0, %v928_v16  ;;  %vm483_vm8 = vcmp.eq.s32.totalorder %v1055_v18, %v465_v28  ;;  %v526_v26 = vadd.f32 %v525_v25, %v524_v22  ;;  %v551_v34 = vadd.f32 %v550_v13, %v549_v27 }
  0xcc   : > { %v552_v35 = vsel %vm196_vm1, %v542_v17, 0.0  ;;  %v543_v39 = vmul.f32 %v1208_v30, %v1087_v37  ;;  %vm507_vm11 = vmand %vm483_vm8, %vm475_vm7  ;;  %v527_v12 = vsel %vm196_vm1, %v1208_v30, 0.0  ;;  %v451_v42 = vsel %vm450_vm9, %v759_v61, 0 }
  0xcd   : > { %v1218_v40 = vsel %vm507_vm11, 1.0, %v928_v16  ;;  %vm452_vm12 = vcmp.gt.s32.totalorder %v1162_v54, 0  ;;  %v553_v43 = vadd.f32 %v552_v35, %v551_v34  ;;  %v528_v45 = vadd.f32 %v527_v12, %v526_v26 }
  0xce   : > { %v554_v46 = vsel %vm196_vm1, %v543_v39, 0.0  ;;  %v544_v47 = vmul.f32 %v1218_v40, %v1084_v36  ;;  %vm466_vm14 = vcmp.lt.s32.totalorder %v451_v42, 14  ;;  %v453_v37 = vsel %vm452_vm12, %v1162_v54, 0 }
  0xcf   : > { %v555_v49 = vadd.f32 %v554_v46, %v553_v43  ;;  %v529_v50 = vsel %vm196_vm1, %v1218_v40, 0.0  ;;  %v467_v53 = vsel %vm466_vm14, %v451_v42, 14  ;;  %vm468_vm15 = vcmp.lt.s32.totalorder %v453_v37, 14 }
  0xd0   : > { %v530_v57 = vadd.f32 %v529_v50, %v528_v45  ;;  %vm476_vm0 = vcmp.gt.f32.partialorder %v1107_v52, 0.0  ;;  %vm484_vm2 = vcmp.eq.s32.totalorder %v1055_v18, %v467_v53  ;;  %v469_v58 = vsel %vm468_vm15, %v453_v37, 14 }
  0xd1   : > { %v556_v59 = vsel %vm196_vm1, %v544_v47, 0.0  ;;  %vm508_vm10 = vmand %vm484_vm2, %vm476_vm0  ;;  %vm477_vm3 = vcmp.gt.f32.partialorder %v1104_v51, 0.0  ;;  %vm485_vm13 = vcmp.eq.s32.totalorder %v1055_v18, %v469_v58  ;;  %v263_v21 = vand.u32 65535, %v1066_v23 }
  0xd2   : > { %v557_v36 = vadd.f32 %v556_v59, %v555_v49  ;;  %v1233_v54 = vsel %vm508_vm10, 1.0, %v928_v16  ;;  %vm509_vm4 = vmand %vm485_vm13, %vm477_vm3  ;;  %v293_v25 = vand.u32 65535, %v1076_v29  ;;  %v278_v26 = vand.u32 65535, %v1097_v44 }
  0xd3   : > { %v531_v61 = vsel %vm196_vm1, %v1233_v54, 0.0  ;;  %v545_v62 = vmul.f32 %v1233_v54, %v1107_v52  ;;  %v1240_v63 = vsel %vm509_vm4, 1.0, %v928_v16  ;;  %v265_v22 = vcvt.s32.f32 %v263_v21 }
  0xd4   : > { %v532_v2 = vadd.f32 %v531_v61, %v530_v57  ;;  %v546_v3 = vmul.f32 %v1240_v63, %v1104_v51  ;;  %v533_v5 = vsel %vm196_vm1, %v1240_v63, 0.0  ;;  %v295_v35 = vcvt.s32.f32 %v293_v25 }
  0xd5   : > { %v558_v18 = vsel %vm196_vm1, %v545_v62, 0.0  ;;  %v280_v42 = vcvt.s32.f32 %v278_v26  ;;  %v308_v23 = vand.u32 65535, %v1102_v48  ;;  %v323_v29 = vand.u32 65535, %v1125_v1 }
  0xd6   : > { %v559_v6 = vadd.f32 %v558_v18, %v557_v36  ;;  %v534_v7 = vadd.f32 %v533_v5, %v532_v2  ;;  %v560_v52 = vsel %vm196_vm1, %v546_v3, 0.0  ;;  %v338_v44 = vand.u32 65535, %v1131_v8 }
  0xd7   : > { %v310_v45 = vcvt.s32.f32 %v308_v23  ;;  %v325_v47 = vcvt.s32.f32 %v323_v29  ;;  %v353_v37 = vand.u32 65535, %v1138_v14  ;;  %v368_v1 = vand.u32 65535, %v1150_v33  ;;  %v215_v29 = vld [vmem:[%s1281_s5 + $0x20] sm:$0xff] }
  0xd8   : > { %v535_v13 = vadd.f32 %v534_v7, %v518_v4  ;;  %v561_v15 = vadd.f32 %v560_v52, %v559_v6  ;;  %v340_v49 = vcvt.s32.f32 %v338_v44  ;;  %v213_v4 = vld [vmem:[%s1281_s5 + $0x10] sm:$0xff] }
  0xd9   : > { %v355_v8 = vcvt.s32.f32 %v353_v37 }
  0xda   : > { %536 = vst.msk [vmem:[#allocation2] sm:$0xff] %vm196_vm1, %v535_v13  ;;  %v562_v17 = vadd.f32 %v561_v15, %v538_v10  ;;  %v212_v13 = vld [vmem:[%s1281_s5 + $0x8] sm:$0xff] }
  0xdc   : > { %563 = vst.msk [vmem:[#allocation2 + $0x8] sm:$0xff] %vm196_vm1, %v562_v17 }
  0xe1   : > { %v634_v51 = vld [vmem:[#allocation2] sm:$0xff] }
  0xe2   : > { %637 = vst.msk [vmem:[%s1044_s30] sm:$0xff] %vm196_vm1, %v634_v51 }
  0xe3   : > { %v635_v20 = vld [vmem:[#allocation2 + $0x8] sm:$0xff] }
  0xe4   : > { %638 = vst.msk [vmem:[%s1044_s30 + $0x8] sm:$0xff] %vm196_vm1, %v635_v20 }
 0x13d   : > { %v268_v27 = vpop.xlane.xlu0 %267 }
 0x13e   : > { %vm269_vm5 = vcmp.eq.f32.partialorder %v1080_v32, %v268_v27  ;;  %v274_v57 = vcvt.f32.s32 %v268_v27 }
 0x13f   : > { %v270_v28 = vsel %vm269_vm5, %v265_v22, inf }
 0x140   : > { %271 = vmin.xlane.f32.xlu0 %v270_v28  ;;  %v275_v58 = vshll.u32 %v274_v57, 16  ;;  %v218_v57 = vld [vmem:[%s1281_s5 + $0x38] sm:$0xff] }
 0x141   : > { %v298_v34 = vpop.xlane.xlu0 %297  ;;  %v283_v12 = vpop.xlane.xlu1 %282 }
 0x142   : > { %vm299_vm6 = vcmp.eq.f32.partialorder %v1089_v38, %v298_v34  ;;  %vm284_vm7 = vcmp.eq.f32.partialorder %v1113_v55, %v283_v12  ;;  %v304_v59 = vcvt.f32.s32 %v298_v34  ;;  %v289_v62 = vcvt.f32.s32 %v283_v12  ;;  %v214_v34 = vld [vmem:[%s1281_s5 + $0x18] sm:$0xff] }
 0x143   : > { %v300_v39 = vsel %vm299_vm6, %v295_v35, inf  ;;  %v285_v43 = vsel %vm284_vm7, %v280_v42, inf }
 0x144   : > { %301 = vmin.xlane.f32.xlu0 %v300_v39  ;;  %286 = vmin.xlane.f32.xlu1 %v285_v43  ;;  %v305_v3 = vshll.u32 %v304_v59, 16  ;;  %v290_v7 = vshll.u32 %v289_v62, 16 }
 0x145   : > { %v313_v32 = vpop.xlane.xlu1 %312 }
 0x146   : > { %vm314_vm8 = vcmp.eq.f32.partialorder %v1117_v60, %v313_v32  ;;  %v319_v10 = vcvt.f32.s32 %v313_v32 }
 0x147   : > { %v328_v46 = vpop.xlane.xlu0 %327  ;;  %v315_v38 = vsel %vm314_vm8, %v310_v45, inf }
 0x148   : > { %316 = vmin.xlane.f32.xlu1 %v315_v38  ;;  %vm329_vm9 = vcmp.eq.f32.partialorder %v1134_v11, %v328_v46  ;;  %v370_v11 = vcvt.s32.f32 %v368_v1  ;;  %v334_v15 = vcvt.f32.s32 %v328_v46  ;;  %v320_v27 = vshll.u32 %v319_v10, 16 }
 0x149   : > { %v330_v48 = vsel %vm329_vm9, %v325_v47, inf  ;;  %v343_v55 = vpop.xlane.xlu1 %342  ;;  %v216_v47 = vld [vmem:[%s1281_s5 + $0x28] sm:$0xff] }
 0x14a   : > { %331 = vmin.xlane.f32.xlu0 %v330_v48  ;;  %vm344_vm11 = vcmp.eq.f32.partialorder %v1144_v24, %v343_v55  ;;  %v929_v24 = vmov 0   ;;  %v349_v20 = vcvt.f32.s32 %v343_v55  ;;  %v335_v35 = vshll.u32 %v334_v15, 16 }
 0x14b   : > { %v1268_v50 = vpop.xlane.xlu0 %357  ;;  %v345_v60 = vsel %vm344_vm11, %v340_v49, inf  ;;  %847 = vset.pattern.permute.xlu1 %v929_v24  ;;  %841 = vset.pattern.permute.xlu0 %v929_v24 }
 0x14c   : > { %346 = vmin.xlane.f32.xlu1 %v345_v60  ;;  %vm359_vm12 = vcmp.eq.f32.partialorder %v1147_v31, %v1268_v50  ;;  %v350_v23 = vshll.u32 %v349_v20, 16  ;;  %v364_v32 = vcvt.f32.s32 %v1268_v50 }
 0x14d   : > { %v360_v14 = vsel %vm359_vm12, %v355_v8, inf  ;;  %v1272_v53 = vpop.xlane.xlu1 %372 }
 0x14e   : > { %361 = vmin.xlane.f32.xlu0 %v360_v14  ;;  %vm374_vm14 = vcmp.eq.f32.partialorder %v1158_v41, %v1272_v53  ;;  %v211_v41 = vld [vmem:[%s1281_s5] sm:$0xff]  ;;  %v365_v49 = vshll.u32 %v364_v32, 16  ;;  %v379_v1 = vcvt.f32.s32 %v1272_v53  ;;  %v217_v14 = vld [vmem:[%s1281_s5 + $0x30] sm:$0xff] }
 0x14f   : > { %v375_v33 = vsel %vm374_vm14, %v370_v11, inf }
 0x150   : > { %376 = vmin.xlane.f32.xlu1 %v375_v33  ;;  %v380_v11 = vshll.u32 %v379_v1, 16 }
 0x1cd   : > { %v272_v31 = vpop.xlane.xlu0 %271 }
 0x1ce   : > { %v273_v36 = vcvt.f32.s32 %v272_v31 }
 0x1d0   : > { %v276_v61 = vadd.s32 %v275_v58, %v273_v36 }
 0x1d1   : > { %v302_v2 = vpop.xlane.xlu0 %301  ;;  %v287_v5 = vpop.xlane.xlu1 %286 }
 0x1d2   : > { %vm382_vm15 = vcmp.eq.s32.totalorder %v276_v61, %v211_v41  ;;  %v303_v18 = vcvt.f32.s32 %v302_v2  ;;  %v288_v52 = vcvt.f32.s32 %v287_v5 }
 0x1d3   : > { %v745_v28 = vsel %vm382_vm15, 1.0, %v928_v16 }
 0x1d4   : > { %v306_v6 = vadd.s32 %v305_v3, %v303_v18  ;;  %v291_v17 = vadd.s32 %v290_v7, %v288_v52 }
 0x1d5   : > { %v317_v21 = vpop.xlane.xlu1 %316 }
 0x1d6   : > { %vm384_vm0 = vcmp.eq.s32.totalorder %v306_v6, %v213_v4  ;;  %vm383_vm2 = vcmp.eq.s32.totalorder %v291_v17, %v212_v13  ;;  %v318_v22 = vcvt.f32.s32 %v317_v21 }
 0x1d7   : > { %v747_v51 = vsel %vm384_vm0, 1.0, %v928_v16  ;;  %v332_v25 = vpop.xlane.xlu0 %331  ;;  %v746_v26 = vsel %vm383_vm2, 1.0, %v928_v16 }
 0x1d8   : > { %578 = vperm.xlu1 %847, %v747_v51   ;;  %v321_v39 = vadd.s32 %v320_v27, %v318_v22  ;;  %v333_v12 = vcvt.f32.s32 %v332_v25  ;;  %v842_v42 = vpack.i.bf16 %v746_v26, %v745_v28  ;;  %v565_v25 = vld [vmem:[#allocation2 + $0x10] sm:$0xff] }
 0x1d9   : > { %v347_v43 = vpop.xlane.xlu1 %346 }
 0x1da   : > { %v336_v45 = vadd.s32 %v335_v35, %v333_v12  ;;  %v348_v44 = vcvt.f32.s32 %v347_v43  ;;  %843 = vperm.xlu0 %841, %v842_v42   ;;  %vm385_vm10 = vcmp.eq.s32.totalorder %v321_v39, %v214_v34 }
 0x1db   : > { %v362_v46 = vpop.xlane.xlu0 %361  ;;  %v748_v38 = vsel %vm385_vm10, 1.0, %v928_v16 }
 0x1dc   : > { %v351_v37 = vadd.s32 %v350_v23, %v348_v44  ;;  %v363_v48 = vcvt.f32.s32 %v362_v46  ;;  %583 = vperm.xlu1 %847, %v748_v38   ;;  %vm386_vm3 = vcmp.eq.s32.totalorder %v336_v45, %v215_v29 }
 0x1dd   : > { %v377_v55 = vpop.xlane.xlu1 %376  ;;  %v749_v50 = vsel %vm386_vm3, 1.0, %v928_v16 }
 0x1de   : > { %vm387_vm13 = vcmp.eq.s32.totalorder %v351_v37, %v216_v47  ;;  %v366_v60 = vadd.s32 %v365_v49, %v363_v48  ;;  %v378_v8 = vcvt.f32.s32 %v377_v55 }
 0x1df   : > { %v750_v33 = vsel %vm387_vm13, 1.0, %v928_v16 }
 0x1e0   : > { %588 = vperm.xlu1 %847, %v749_v50   ;;  %v381_v24 = vadd.s32 %v380_v11, %v378_v8  ;;  %vm388_vm4 = vcmp.eq.s32.totalorder %v366_v60, %v217_v14 }
 0x1e1   : > { %v751_v31 = vsel %vm388_vm4, 1.0, %v928_v16 }
 0x1e2   : > { %vm389_vm5 = vcmp.eq.s32.totalorder %v381_v24, %v218_v57 }
 0x1e3   : > { %v752_v53 = vsel %vm389_vm5, 1.0, %v928_v16 }
 0x1e4   : > { %593 = vperm.xlu1 %847, %v750_v33  }
 0x1e8   : > { %598 = vperm.xlu1 %847, %v751_v31  }
 0x1ec   : > { %603 = vperm.xlu1 %847, %v752_v53  }
 0x257   : > { %v579_v58 = vpop.permute.xlu1 %578 }
 0x258   : > { %v608_v62 = vmul.f32 %v579_v58, %v1167_v56 }
 0x259   : > { %v844_v59 = vpop.permute.xlu0 %843 }
 0x25a   : > { %v846_v36 = vunpack.i.h.bf16 %v844_v59  ;;  %v845_v41 = vunpack.i.l.bf16 %v844_v59  ;;  %v617_v7 = vsel %vm196_vm1, %v608_v62, 0.0 }
 0x25b   : > { %v584_v61 = vpop.permute.xlu1 %583 }
 0x25c   : > { %v607_v2 = vmul.f32 %v846_v36, %v1185_v19  ;;  %v606_v3 = vmul.f32 %v845_v41, %v1182_v0  ;;  %v609_v5 = vmul.f32 %v584_v61, %v1196_v9 }
 0x25e   : > { %v615_v18 = vsel %vm196_vm1, %v607_v2, 0.0  ;;  %v614_v4 = vsel %vm196_vm1, %v606_v3, 0.0  ;;  %v619_v52 = vsel %vm196_vm1, %v609_v5, 0.0 }
 0x25f   : > { %v616_v6 = vadd.f32 %v615_v18, %v614_v4  ;;  %v589_v16 = vpop.permute.xlu1 %588 }
 0x260   : > { %v610_v13 = vmul.f32 %v589_v16, %v1208_v30 }
 0x261   : > { %v618_v10 = vadd.f32 %v617_v7, %v616_v6 }
 0x262   : > { %v621_v0 = vsel %vm196_vm1, %v610_v13, 0.0 }
 0x263   : > { %v620_v56 = vadd.f32 %v619_v52, %v618_v10  ;;  %v594_v15 = vpop.permute.xlu1 %593 }
 0x264   : > { %v611_v19 = vmul.f32 %v594_v15, %v1218_v40 }
 0x265   : > { %v622_v17 = vadd.f32 %v621_v0, %v620_v56 }
 0x266   : > { %v623_v9 = vsel %vm196_vm1, %v611_v19, 0.0 }
 0x267   : > { %v599_v51 = vpop.permute.xlu1 %598  ;;  %v624_v27 = vadd.f32 %v623_v9, %v622_v17 }
 0x268   : > { %v612_v20 = vmul.f32 %v599_v51, %v1233_v54 }
 0x26a   : > { %v625_v21 = vsel %vm196_vm1, %v612_v20, 0.0 }
 0x26b   : > { %v604_v30 = vpop.permute.xlu1 %603  ;;  %v626_v40 = vadd.f32 %v625_v21, %v624_v27 }
 0x26c   : > { %v613_v22 = vmul.f32 %v604_v30, %v1240_v63 }
 0x26e   : > { %v627_v28 = vsel %vm196_vm1, %v613_v22, 0.0 }
 0x26f   : > { %v628_v26 = vadd.f32 %v627_v28, %v626_v40 }
 0x271   : > { %v629_v34 = vadd.f32 %v628_v26, %v565_v25 }
 0x273   : > { %630 = vst.msk [vmem:[#allocation2 + $0x10] sm:$0xff] %vm196_vm1, %v629_v34 }
 0x27a   : > { %v636_v54 = vld [vmem:[#allocation2 + $0x10] sm:$0xff] }
 0x27b   : > { %639 = vst.msk [vmem:[%s1044_s30 + $0x10] sm:$0xff] %vm196_vm1, %v636_v54 }
 0x27c   : > { %861 = shalt.err (!%p858_p5)
}
 0x27d   : > { %s862_s25 = scalar_lea.hbm %s1324_s16, 384  ;;  %s866_s28 = scalar_lea.hbm %s1380_s2, 768 }
 0x27e   : > { %p863_p6 = scmp.ne.s32.totalorder %s1324_s16, %s862_s25  ;;  %p867_p10 = scmp.lt.u32.totalorder %s1324_s16, %s1380_s2 }
 0x27f   : > { %p868_p11 = scmp.lt.u32.totalorder %s866_s28, %s862_s25  ;;  %p870_p13 = scmp.lt.u32.totalorder %s862_s25, %s1324_s16 }
 0x280   : > { %p864_p7 = pnand %p863_p6, %p988_p4 }
 0x281   : > { %p869_p12 = por %p868_p11, %p867_p10 }
 0x282   : > { %p865_p9 = pneg %p864_p7 }
 0x283   : > { %p871_p0 = por %p870_p13, %p869_p12 }
 0x285   : > { %p872_p1 = pnand %p871_p0, %p865_p9 }
 0x287   : > { %875 = shalt.err (!%p872_p1)
}
 0x288   : > { %s931_s3 = smov 128   ;;  %s932_s4 = smov 8  }
 0x289   : > { %782 = dma.vmem_to_hbm [thread:$0]  (%p988_p4), %s1326_s7, 384, %s1324_s16, %s1332_s18, %s931_s3, %s931_s3, %s932_s4  }
 0x28a PF: > { %p788_p2 = scmp.ge.s32.totalorder %s926_s14, 2  ;;  %s669_s5 = sand.u32 1, %s906_s9  }
 0x28b   : > { %s670_s6 = scalar_lea.sflag [#allocation4], %s669_s5 }
 0x28c   : > { %p785_p3 = pnand %p788_p2, %p995_p8 }
 0x28e   : > { %901 = dma.done.wait (!%p785_p3), %s670_s6, 384  }
 0x28f   : > { %903 = vsyncadd (!%p785_p3), %s670_s6, 4294966912  ;;  %s15_s14 = sadd.s32 1, %s926_s14   ;;  %s1383_s9 = smov %s910_s10 }
 0x290   : > { %p12_p5 = scmp.ge.s32.totalorder %s15_s14, 4   ;;  %s1384_s10 = smov %s914_s11 }
 0x291   : > { %s1385_s11 = smov %s1001_s22  ;;  %s1386_s12 = smov %s922_s13 }
 0x292   : > { %s1387_s13 = smov %s1389_s17  ;;  %14 = sbr.rel (!%p12_p5) target bundleno = 4 (0x4), region = 76 }
 0x299   :  { %675 = vsyncpa [#allocation4], 1 }
 0x29a   :  { %677 = vsyncpa [#allocation4 + $0x1], 1 }

</bundles_post_ra>
